<compile_context>
chip_gen: v7x
topology: tpu7x:2x2x1
jax: 0.10.0
libtpu: 0.0.40
codegen_flags: <defaults>
</compile_context>

<pallas_src>
import functools

import jax
import jax.numpy as jnp
from jax.experimental import pallas as pl
from jax.experimental.pallas import tpu as pltpu


def _round_up(x, m):
    return ((x + m - 1) // m) * m


def _round_down(x, m):
    return (x // m) * m


def _vmem_capacity_bytes():
    # 128 MiB on v5e/v6e, 64 MiB per TensorCore on v7x; conservative fallback.
    try:
        cap = getattr(pltpu.get_tpu_info(), "vmem_capacity_bytes", None)
        if cap:
            return int(cap)
    except Exception:
        pass
    return 64 << 20


# ----------------------------- kernels ---------------------------------------


def mlp_kernel_resident(x_ref, wfc_ref, wproj_ref, o_ref):
    # Whole (padded) hidden dim resident in VMEM: one fused step per token tile.
    # x_ref:     (tm, E_pad)   bf16
    # wfc_ref:   (E_pad, F_pad) bf16 (pre-transposed, single-buffered)
    # wproj_ref: (F_pad, E_pad) bf16 (pre-transposed, single-buffered)
    # o_ref:     (tm, E_pad)   x.dtype
    h = jnp.dot(x_ref[...], wfc_ref[...], preferred_element_type=jnp.float32)
    h = jnp.maximum(h, 0.0)
    h = h * h
    out = jnp.dot(h.astype(wproj_ref.dtype), wproj_ref[...],
                  preferred_element_type=jnp.float32)
    o_ref[...] = out.astype(o_ref.dtype)


def mlp_kernel_ftiled(x_ref, wfc_ref, wproj_ref, o_ref, acc_ref):
    # Fallback when the weights do not fit VMEM: reduce over F tiles with an
    # f32 accumulator; output committed (in o_ref.dtype) on the last F step.
    f = pl.program_id(1)

    @pl.when(f == 0)
    def _():
        acc_ref[...] = jnp.zeros_like(acc_ref)

    h = jnp.dot(x_ref[...], wfc_ref[...], preferred_element_type=jnp.float32)
    h = jnp.maximum(h, 0.0)
    h = h * h
    acc_ref[...] += jnp.dot(h.astype(wproj_ref.dtype), wproj_ref[...],
                            preferred_element_type=jnp.float32)

    @pl.when(f == pl.num_programs(1) - 1)
    def _():
        o_ref[...] = acc_ref[...].astype(o_ref.dtype)


# ----------------------------- wrapper ---------------------------------------


def prepare_mlp_weights(w_fc_t, w_proj_t):
    """Pad weights to multiples of 128 and cast to bf16 ONCE (outside the jit).

    w_fc_t: (E, F) == c_fc.weight.T ; w_proj_t: (F, E) == c_proj.weight.T.
    Zero padding is exact for this MLP (relu(0)^2 == 0, zero rows/cols add 0).
    """
    E, F = w_fc_t.shape
    assert w_proj_t.shape == (F, E)
    E_pad, F_pad = _round_up(E, 128), _round_up(F, 128)
    wfc = w_fc_t.astype(jnp.bfloat16)
    wproj = w_proj_t.astype(jnp.bfloat16)
    if (E_pad, F_pad) != (E, F):
        wfc = jnp.zeros((E_pad, F_pad), jnp.bfloat16).at[:E, :F].set(wfc)
        wproj = jnp.zeros((F_pad, E_pad), jnp.bfloat16).at[:F, :E].set(wproj)
    return wfc, wproj


@functools.partial(jax.jit, static_argnames=("tm", "max_tf"))
def mlp_pallas(x, wfc_p, wproj_p, *, tm=256, max_tf=None):
    """x: (B, T, E); wfc_p: (E_pad, F_pad) bf16; wproj_p: (F_pad, E_pad) bf16."""
    B, T, E = x.shape
    E_pad, F_pad = wfc_p.shape
    assert wproj_p.shape == (F_pad, E_pad)
    assert E <= E_pad and E_pad % 128 == 0 and F_pad % 128 == 0
    M = B * T
    out_itemsize = jnp.dtype(x.dtype).itemsize

    # ---------------- trace-time plan (all shapes static) --------------------
    vmem_cap = _vmem_capacity_bytes()
    vmem_budget = vmem_cap - (8 << 20)        # headroom for compiler scratch

    # Token tile: multiple of 16 (bf16 sublane packing).  Cap it so the
    # 'parallel' M axis has >= 2 steps whenever M allows (v7x 2-TC sharding).
    M_pad = _round_up(M, 16)
    tm_ = min(_round_up(max(tm, 16), 16), M_pad)
    if M_pad >= 32:
        tm_ = min(tm_, max(16, _round_down(M_pad // 2, 16)))

    # Hidden tile: prefer tf == F_pad (weights resident, streamed once).
    divisors = [128 * d for d in range(1, F_pad // 128 + 1)
                if (F_pad // 128) % d == 0]
    tf_cap = (F_pad if max_tf is None
              else max(128, _round_down(min(max_tf, F_pad), 128)))
    tf_ = max(t for t in divisors if t <= tf_cap)

    def vmem_need(tm__, tf__):
        n_f__ = F_pad // tf__
        w_bufs = 1 if n_f__ == 1 else 2
        return (2 * tm__ * E_pad * 2                       # x tile, bf16, 2-deep
                + 2 * tm__ * E_pad * out_itemsize          # out tile, 2-deep
                + w_bufs * E_pad * tf__ * 2                # Wfc tile(s), bf16
                + w_bufs * tf__ * E_pad * 2                # Wproj tile(s), bf16
                + (0 if n_f__ == 1 else tm__ * E_pad * 4)  # f32 accumulator
                + tm__ * tf__ * 4)                         # f32 h intermediate

    # Shrink tm (activation footprint) before giving up hidden-dim residency;
    # only tile F as a last resort.
    while vmem_need(tm_, tf_) > vmem_budget and tm_ > 16:
        tm_ = max(16, _round_down(tm_ // 2, 16))
    while vmem_need(tm_, tf_) > vmem_budget and tf_ > 128:
        tf_ = max(t for t in divisors if t < tf_)

    n_f = F_pad // tf_
    single_f = n_f == 1
    M_pad = _round_up(M_pad, tm_)
    n_m = M_pad // tm_

    need = vmem_need(tm_, tf_)
    vmem_limit = int(min(max(need + (4 << 20), 32 << 20), vmem_budget))

    # ---------------- operand padding (only when actually needed) ------------
    x2d = x.reshape(M, E).astype(jnp.bfloat16)
    if (M_pad, E_pad) != (M, E):
        x2d = jnp.zeros((M_pad, E_pad), jnp.bfloat16).at[:M, :E].set(x2d)

    cost = pl.CostEstimate(
        flops=4 * M_pad * E_pad * F_pad,                     # two matmuls
        transcendentals=0,
        bytes_accessed=(M_pad * E_pad * 2                    # x (bf16)
                        + M_pad * E_pad * out_itemsize       # out
                        # weights re-stream once per M tile when F is tiled:
                        + (1 if single_f else n_m) * 2 * E_pad * F_pad * 2),
    )

    if single_f:
        grid = (n_m,)
        in_specs = [
            pl.BlockSpec((tm_, E_pad), lambda i: (i, 0)),
            # Constant index_map -> weights fetched once; single-buffer them.
            pl.BlockSpec((E_pad, F_pad), lambda i: (0, 0),
                         pipeline_mode=pl.Buffered(1)),
            pl.BlockSpec((F_pad, E_pad), lambda i: (0, 0),
                         pipeline_mode=pl.Buffered(1)),
        ]
        out_specs = pl.BlockSpec((tm_, E_pad), lambda i: (i, 0))
        scratch_shapes = []
        kernel = mlp_kernel_resident
        dim_sem = ("parallel",)
    else:
        grid = (n_m, n_f)
        in_specs = [
            pl.BlockSpec((tm_, E_pad), lambda i, f: (i, 0)),
            # Default 2-deep pipeline; raise to pl.Buffered(3) if profiling
            # shows exposed weight DMA on this fallback path.
            pl.BlockSpec((E_pad, tf_), lambda i, f: (0, f)),
            pl.BlockSpec((tf_, E_pad), lambda i, f: (f, 0)),
        ]
        out_specs = pl.BlockSpec((tm_, E_pad), lambda i, f: (i, 0))
        scratch_shapes = [pltpu.VMEM((tm_, E_pad), jnp.float32)]
        kernel = mlp_kernel_ftiled
        dim_sem = ("parallel", "arbitrary")

    out_p = pl.pallas_call(
        kernel,
        out_shape=jax.ShapeDtypeStruct((M_pad, E_pad), x.dtype),
        grid_spec=pltpu.PrefetchScalarGridSpec(
            num_scalar_prefetch=0,
            grid=grid,
            in_specs=in_specs,
            out_specs=out_specs,
            scratch_shapes=scratch_shapes,
        ),
        compiler_params=pltpu.CompilerParams(
            dimension_semantics=dim_sem,
            vmem_limit_bytes=vmem_limit),
        cost_estimate=cost,
    )(x2d, wfc_p, wproj_p)

    out = out_p if (M_pad, E_pad) == (M, E) else out_p[:M, :E]
    return out.reshape(B, T, E)


# ----------------------------- references ------------------------------------


def mlp_reference_f32(x, w_fc_t, w_proj_t):
    h = jnp.einsum("bte,ef->btf", x, w_fc_t)
    h = jnp.square(jnp.maximum(h, 0.0))
    return jnp.einsum("btf,fe->bte", h, w_proj_t)


def mlp_reference_bf16(x, w_fc_t, w_proj_t):
    # Mirrors the kernel's numerics: bf16 operands, f32 accumulation, f32 relu^2.
    xb = x.astype(jnp.bfloat16)
    wf = w_fc_t.astype(jnp.bfloat16)
    wp = w_proj_t.astype(jnp.bfloat16)
    h = jnp.einsum("bte,ef->btf", xb, wf, preferred_element_type=jnp.float32)
    h = jnp.square(jnp.maximum(h, 0.0))
    out = jnp.einsum("btf,fe->bte", h.astype(jnp.bfloat16), wp,
                     preferred_element_type=jnp.float32)
    return out.astype(x.dtype)


if __name__ == "__main__":
    # Config implied by the module: embed_dim=32, ff_dim=128 (4x); small tokens.
    # NOTE: at these toy sizes the kernel is latency-bound (single grid point);
    # real tuning targets GPT shapes (E>=768) where the resident-weight path
    # and M-parallel grid actually matter.
    embed_dim, ff_dim = 32, 128
    batch, seq = 2, 8

    key = jax.random.PRNGKey(0)
    k_x, k_fc, k_proj, k_x2, k_fc2, k_proj2 = jax.random.split(key, 6)

    x = jax.random.normal(k_x, (batch, seq, embed_dim), dtype=jnp.float32)

    # c_fc: nn.Linear(embed_dim, ff_dim, bias=False) -> weight (ff_dim, embed_dim),
    # stored here pre-transposed as (embed_dim, ff_dim).
    w_fc_t = (jax.random.normal(k_fc, (embed_dim, ff_dim), dtype=jnp.float32)
              * (1.0 / jnp.sqrt(embed_dim)))
    # c_proj: weight zeroed in __init__ (weight.data.zero_()), pre-transposed
    # as (ff_dim, embed_dim).
    w_proj_t = jnp.zeros((ff_dim, embed_dim), dtype=jnp.float32)

    wfc_p, wproj_p = prepare_mlp_weights(w_fc_t, w_proj_t)   # once, outside jit
    out = jax.block_until_ready(mlp_pallas(x, wfc_p, wproj_p))
    assert out.shape == (batch, seq, embed_dim)
    # Zero-initialized c_proj => the module's output is exactly zero.
    assert jnp.allclose(out, jnp.zeros_like(out))

    # Exercise the full compute path (resident-weight kernel) with nonzero c_proj.
    w_proj_nz = (jax.random.normal(k_proj, (ff_dim, embed_dim), dtype=jnp.float32)
                 * (1.0 / jnp.sqrt(ff_dim)))
    wfc_p, wproj_nz_p = prepare_mlp_weights(w_fc_t, w_proj_nz)
    out_nz = jax.block_until_ready(mlp_pallas(x, wfc_p, wproj_nz_p))
    ref_bf16 = mlp_reference_bf16(x, w_fc_t, w_proj_nz)
    ref_f32 = mlp_reference_f32(x, w_fc_t, w_proj_nz)
    # Tolerances: bf16 operand casts (relu^2 amplifies magnitudes) vs f32 ref.
    assert jnp.allclose(out_nz, ref_bf16, atol=2e-2, rtol=2e-2), (
        float(jnp.max(jnp.abs(out_nz - ref_bf16))))
    assert jnp.allclose(out_nz, ref_f32, atol=1e-1, rtol=5e-2), (
        float(jnp.max(jnp.abs(out_nz - ref_f32))))

    # Exercise the F-tiled fallback path + multi-step parallel M axis by
    # forcing max_tf < F_pad on a slightly larger (still small) config.
    E2, F2, B2, T2 = 128, 512, 2, 32
    x2 = jax.random.normal(k_x2, (B2, T2, E2), dtype=jnp.float32)
    w_fc2 = (jax.random.normal(k_fc2, (E2, F2), dtype=jnp.float32)
             * (1.0 / jnp.sqrt(E2)))
    w_pr2 = (jax.random.normal(k_proj2, (F2, E2), dtype=jnp.float32)
             * (1.0 / jnp.sqrt(F2)))
    wfc2_p, wpr2_p = prepare_mlp_weights(w_fc2, w_pr2)
    out2 = jax.block_until_ready(mlp_pallas(x2, wfc2_p, wpr2_p, max_tf=128))
    ref2 = mlp_reference_bf16(x2, w_fc2, w_pr2)
    assert jnp.allclose(out2, ref2, atol=3e-2, rtol=3e-2), (
        float(jnp.max(jnp.abs(out2 - ref2))))

    print("KERNEL_OK")
</pallas_src>

<mosaic_0001>
module attributes {stable_mosaic.version = 11 : i64} {
  func.func @mlp_kernel_resident(%arg0: i32, %arg1: memref<16x128xbf16, #tpu.memory_space<vmem>>, %arg2: memref<128x128xbf16, #tpu.memory_space<vmem>>, %arg3: memref<128x128xbf16, #tpu.memory_space<vmem>>, %arg4: memref<16x128xf32, #tpu.memory_space<vmem>>) attributes {dimension_semantics = [#tpu.dimension_semantics<parallel>], iteration_bounds = array<i64: 1>, scalar_prefetch = 0 : i64, scratch_operands = 0 : i64, tpu.core_type = #tpu.core_type<tc>, window_params = [{transform_indices = @transform_0, window_bounds = array<i64: 16, 128>}, {pipeline_mode = #tpu.pipeline_mode<synchronous>, transform_indices = @transform_1, window_bounds = array<i64: 128, 128>}, {pipeline_mode = #tpu.pipeline_mode<synchronous>, transform_indices = @transform_2, window_bounds = array<i64: 128, 128>}, {transform_indices = @transform_3, window_bounds = array<i64: 16, 128>}]} {
    %c0 = arith.constant 0 : index
    %c0_0 = arith.constant 0 : index
    %0 = vector.load %arg1[%c0, %c0_0] : memref<16x128xbf16, #tpu.memory_space<vmem>>, vector<16x128xbf16>
    %c0_1 = arith.constant 0 : index
    %c0_2 = arith.constant 0 : index
    %1 = vector.load %arg2[%c0_1, %c0_2] : memref<128x128xbf16, #tpu.memory_space<vmem>>, vector<128x128xbf16>
    %cst = arith.constant dense<0.000000e+00> : vector<16x128xf32>
    %2 = tpu.matmul %0, %1, %cst {dimension_numbers = #tpu.dot_dimension_numbers<[1], [0], [0], [1], [0, 0, 1, 1], [], []>} : vector<16x128xbf16>, vector<128x128xbf16>, vector<16x128xf32> -> vector<16x128xf32>
    %cst_3 = arith.constant 0.000000e+00 : f32
    %3 = vector.broadcast %cst_3 : f32 to vector<16x128xf32>
    %4 = arith.maximumf %2, %3 : vector<16x128xf32>
    %5 = arith.mulf %4, %4 : vector<16x128xf32>
    %6 = arith.truncf %5 : vector<16x128xf32> to vector<16x128xbf16>
    %c0_4 = arith.constant 0 : index
    %c0_5 = arith.constant 0 : index
    %7 = vector.load %arg3[%c0_4, %c0_5] : memref<128x128xbf16, #tpu.memory_space<vmem>>, vector<128x128xbf16>
    %cst_6 = arith.constant dense<0.000000e+00> : vector<16x128xf32>
    %8 = tpu.matmul %6, %7, %cst_6 {dimension_numbers = #tpu.dot_dimension_numbers<[1], [0], [0], [1], [0, 0, 1, 1], [], []>} : vector<16x128xbf16>, vector<128x128xbf16>, vector<16x128xf32> -> vector<16x128xf32>
    %c0_7 = arith.constant 0 : index
    %c0_8 = arith.constant 0 : index
    %9 = vector.load %arg4[%c0_7, %c0_8] : memref<16x128xf32, #tpu.memory_space<vmem>>, vector<16x128xf32>
    tpu.vector_store %arg4[%c0_7, %c0_8], %8 {strides = array<i32>} : memref<16x128xf32, #tpu.memory_space<vmem>>, vector<16x128xf32>,
    return
  }
  func.func @transform_0(%arg0: i32) -> (i32, i32) {
    %c0_i32 = arith.constant 0 : i32
    %c0_i32_0 = arith.constant 0 : i32
    return %arg0, %c0_i32 : i32, i32
  }
  func.func @transform_1(%arg0: i32) -> (i32, i32) {
    %c0_i32 = arith.constant 0 : i32
    %c0_i32_0 = arith.constant 0 : i32
    %c0_i32_1 = arith.constant 0 : i32
    return %c0_i32, %c0_i32_0 : i32, i32
  }
  func.func @transform_2(%arg0: i32) -> (i32, i32) {
    %c0_i32 = arith.constant 0 : i32
    %c0_i32_0 = arith.constant 0 : i32
    %c0_i32_1 = arith.constant 0 : i32
    return %c0_i32, %c0_i32_0 : i32, i32
  }
  func.func @transform_3(%arg0: i32) -> (i32, i32) {
    %c0_i32 = arith.constant 0 : i32
    %c0_i32_0 = arith.constant 0 : i32
    return %arg0, %c0_i32 : i32, i32
  }
}

</mosaic_0001>

<bundles_post_ra>
// kernel: mlp_pallas.1
= control target key start
LH: loop header
LB: loop body
LE: loop exit
PB: predicated region body
PF: predicated region fallthrough
CT: control target
= control target key end

     0   :  { %8 = vsyncpa [#allocation3], 0  ;;  %s479_s0 = inlined_call_operand.vmem [shape: bf16[16,128], index: 0, kind: input, shape index: {}]   ;;  %s480_s1 = inlined_call_operand.hbm [shape: bf16[128,128], index: 1, kind: input, shape index: {}]   ;;  %s481_s2 = inlined_call_operand.hbm [shape: bf16[128,128], index: 2, kind: input, shape index: {}]   ;;  %s482_s3 = inlined_call_operand.vmem [shape: f32[16,128], index: 3, kind: output, shape index: {}]  }
   0x1   :  { %9 = vsyncpa [#allocation5], 0  ;;  %s420_s12 = smov [#allocation2]   ;;  %s372_s16 = scalar_lea.hbm %s480_s1, 1024 }
   0x2   :  { %s17_s13 = sshll.u32 %s420_s12, 4  ;;  %p373_p0 = scmp.ne.s32.totalorder %s480_s1, %s372_s16  ;;  %s18_s13 = int_to_ptr.vmem [resolvable:$true] %s17_s13 }
   0x3   :  { %p376_p1 = scmp.lt.u32.totalorder %s372_s16, %s480_s1 }
   0x5   :  { %p378_p2 = pnand %p376_p1, %p373_p0 }
   0x7   :  { %381 = shalt.err (!%p378_p2)
}
   0x8   :  { %s382_s21 = scalar_lea.vmem %s18_s13, 1024  ;;  %p387_p4 = scmp.lt.s32.totalorder %s18_s13, %s18_s13 }
   0x9   :  { %p383_p3 = scmp.ne.s32.totalorder %s18_s13, %s382_s21  ;;  %p388_p5 = scmp.lt.s32.totalorder %s382_s21, %s382_s21 }
   0xb   :  { %p389_p6 = por %p388_p5, %p387_p4 }
   0xd   :  { %p390_p7 = pnand %p389_p6, %p383_p3 }
   0xf   :  { %393 = shalt.err (!%p390_p7)
}
  0x10   :  { %s421_s22 = smov 64   ;;  %s422_s23 = smov 4  }
  0x11   :  { %23 = dma.hbm_to_vmem [thread:$0]  %s480_s1, 1024, %s18_s13, [#allocation3], %s421_s22, %s421_s22, %s422_s23  }
  0x12   :  { %s423_s26 = smov [#allocation4]   ;;  %s394_s30 = scalar_lea.hbm %s481_s2, 1024 }
  0x13   :  { %s29_s27 = sshll.u32 %s423_s26, 4  ;;  %p395_p8 = scmp.ne.s32.totalorder %s481_s2, %s394_s30  ;;  %s30_s27 = int_to_ptr.vmem [resolvable:$true] %s29_s27 }
  0x14   :  { %p398_p9 = scmp.lt.u32.totalorder %s394_s30, %s481_s2 }
  0x16   :  { %p400_p10 = pnand %p398_p9, %p395_p8 }
  0x18   :  { %403 = shalt.err (!%p400_p10)
}
  0x19   :  { %s404_s8 = scalar_lea.vmem %s30_s27, 1024  ;;  %p409_p12 = scmp.lt.s32.totalorder %s30_s27, %s30_s27 }
  0x1a   :  { %p405_p11 = scmp.ne.s32.totalorder %s30_s27, %s404_s8  ;;  %p410_p13 = scmp.lt.s32.totalorder %s404_s8, %s404_s8 }
  0x1c   :  { %p411_p0 = por %p410_p13, %p409_p12 }
  0x1e   :  { %p412_p1 = pnand %p411_p0, %p405_p11 }
  0x20   :  { %415 = shalt.err (!%p412_p1)
}
  0x21   :  { %35 = dma.hbm_to_vmem [thread:$0]  %s481_s2, 1024, %s30_s27, [#allocation5], %s421_s22, %s421_s22, %s422_s23  }
  0x22   :  { %416 = dma.done.wait [#allocation3], 1024  }
  0x23   :  { %417 = vsyncadd [#allocation3], 4294966272 }
  0x24   :  { %418 = dma.done.wait [#allocation5], 1024  }
  0x25   :  { %419 = vsyncadd [#allocation5], 4294966272  ;;  %v424_v0 = vmov 0.0   ;;  %vm425_vm0 = vmmov 0   ;;  %v355_v1 = vld [vmem:[#allocation2] sm:$0xff]   ;;  %v356_v2 = vld [vmem:[#allocation2 + $0x8] sm:$0xff]  }
  0x26   :  { %309 = vmatprep.subr.bf16.mxu0 %v424_v0  ;;  %325 = vmatprep.mubr.msk.bf16.mxu0 %vm425_vm0, %v424_v0  ;;  %v357_v3 = vld [vmem:[#allocation2 + $0x10] sm:$0xff]   ;;  %v364_v4 = vld [vmem:[#allocation4] sm:$0xff]   ;;  %v358_v5 = vld [vmem:[#allocation2 + $0x18] sm:$0xff]  }
  0x27   :  { %329 = vmatprep.subr.bf16.mxu1 %v424_v0  ;;  %345 = vmatprep.mubr.msk.bf16.mxu1 %vm425_vm0, %v424_v0  ;;  %v365_v6 = vld [vmem:[#allocation4 + $0x8] sm:$0xff]   ;;  %v359_v7 = vld [vmem:[#allocation2 + $0x20] sm:$0xff]   ;;  %v366_v8 = vld [vmem:[#allocation4 + $0x10] sm:$0xff]  }
  0x28   :  { %310 = vmatpush3.bf16.msra.mxu0 %v355_v1  ;;  %330 = vmatpush3.bf16.msra.mxu1 %v364_v4  ;;  %v360_v9 = vld [vmem:[#allocation2 + $0x28] sm:$0xff]   ;;  %v367_v10 = vld [vmem:[#allocation4 + $0x18] sm:$0xff]   ;;  %v361_v11 = vld [vmem:[#allocation2 + $0x30] sm:$0xff]  }
  0x29   :  { %311 = vmatprep.subr.bf16.mxu0 %v424_v0  ;;  %331 = vmatprep.subr.bf16.mxu1 %v424_v0  ;;  %v368_v12 = vld [vmem:[#allocation4 + $0x20] sm:$0xff]   ;;  %v362_v13 = vld [vmem:[#allocation2 + $0x38] sm:$0xff]   ;;  %v369_v14 = vld [vmem:[#allocation4 + $0x28] sm:$0xff]  }
  0x2a   :  { %v363_v15 = vld [vmem:[%s479_s0] sm:$0xff]   ;;  %v370_v16 = vld [vmem:[#allocation4 + $0x30] sm:$0xff]   ;;  %v371_v17 = vld [vmem:[#allocation4 + $0x38] sm:$0xff]  }
  0x2c   :  { %312 = vmatpush3.bf16.msra.mxu0 %v356_v2  ;;  %332 = vmatpush3.bf16.msra.mxu1 %v365_v6 }
  0x2d   :  { %313 = vmatprep.subr.bf16.mxu0 %v424_v0  ;;  %333 = vmatprep.subr.bf16.mxu1 %v424_v0 }
  0x30   :  { %314 = vmatpush3.bf16.msra.mxu0 %v357_v3  ;;  %334 = vmatpush3.bf16.msra.mxu1 %v366_v8 }
  0x31   :  { %315 = vmatprep.subr.bf16.mxu0 %v424_v0  ;;  %335 = vmatprep.subr.bf16.mxu1 %v424_v0 }
  0x34   :  { %316 = vmatpush3.bf16.msra.mxu0 %v358_v5  ;;  %336 = vmatpush3.bf16.msra.mxu1 %v367_v10 }
  0x35   :  { %317 = vmatprep.subr.bf16.mxu0 %v424_v0  ;;  %337 = vmatprep.subr.bf16.mxu1 %v424_v0 }
  0x38   :  { %318 = vmatpush3.bf16.msra.mxu0 %v359_v7  ;;  %338 = vmatpush3.bf16.msra.mxu1 %v368_v12 }
  0x39   :  { %319 = vmatprep.subr.bf16.mxu0 %v424_v0  ;;  %339 = vmatprep.subr.bf16.mxu1 %v424_v0 }
  0x3c   :  { %320 = vmatpush3.bf16.msra.mxu0 %v360_v9  ;;  %340 = vmatpush3.bf16.msra.mxu1 %v369_v14 }
  0x3d   :  { %321 = vmatprep.subr.bf16.mxu0 %v424_v0  ;;  %341 = vmatprep.subr.bf16.mxu1 %v424_v0 }
  0x40   :  { %322 = vmatpush3.bf16.msra.mxu0 %v361_v11  ;;  %342 = vmatpush3.bf16.msra.mxu1 %v370_v16 }
  0x41   :  { %323 = vmatprep.subr.bf16.mxu0 %v424_v0  ;;  %343 = vmatprep.subr.bf16.mxu1 %v424_v0 }
  0x44   :  { %324 = vmatpush3.bf16.msra.mxu0 %v362_v13  ;;  %344 = vmatpush3.bf16.msra.mxu1 %v371_v17 }
  0x47   :  { %326 = vmatmul.mubr.bf16.vlgmr.msra.gmra.mrb[0].mxu0 %v363_v15 }
 0x11a   :  { %v149_v18 = vpop.f32.mrb[0].mxu0 }
 0x11b   :  { %v156_v19 = vmax.f32 %v149_v18, 0.0  ;;  %v327_v20 = vpop.f32.mrb[1].mxu0 }
 0x11c   :  { %v152_v21 = vpop.f32.mrb[2].mxu0 }
 0x11d   :  { %v157_v22 = vmax.f32 %v152_v21, 0.0  ;;  %v328_v23 = vpop.f32.mrb[3].mxu0  ;;  %v158_v24 = vmul.f32 %v156_v19, %v156_v19 }
 0x11f   :  { %v159_v25 = vmul.f32 %v157_v22, %v157_v22 }
 0x121   :  { %v160_v26 = vpack.c.bf16 %v159_v25, %v158_v24 }
 0x123   :  { %346 = vmatmul.mubr.bf16.vlgmr.msra.gmra.mrb[0].mxu1 %v160_v26 }
 0x1f6   :  { %v259_v27 = vpop.f32.mrb[0].mxu1 }
 0x1f7   :  { %266 = vst [vmem:[%s482_s3] sm:$0xff] %v259_v27  ;;  %v347_v28 = vpop.f32.mrb[1].mxu1 }
 0x1f8   :  { %v262_v29 = vpop.f32.mrb[2].mxu1 }
 0x1f9   :  { %267 = vst [vmem:[%s482_s3 + $0x8] sm:$0xff] %v262_v29  ;;  %v348_v30 = vpop.f32.mrb[3].mxu1 }
 0x1fa   :  { %272 = vsyncpa [#allocation3], 1 }
 0x1fb   :  { %273 = vsyncpa [#allocation5], 1 }

</bundles_post_ra>
